<compile_context>
chip_gen: v5e
topology: v5e:2x2
jax: 0.10.0
libtpu: 0.0.40
codegen_flags: <defaults>
</compile_context>

<pallas_src>
import functools

import jax
import jax.numpy as jnp
from jax.experimental import pallas as pl
from jax.experimental.pallas import tpu as pltpu

# Target per-input block footprint (bytes).  2 inputs x 2 pipeline buffers x
# 2 MiB = 8 MiB of VMEM, safely under the scoped-VMEM default on v5e/v6e/v7x.
_TARGET_BLOCK_BYTES = 2 * 1024 * 1024


def _smooth_kernel(re_ref, im_ref, o_ref, acc_ref, *,
                   use_xy, use_diag, denom_x, denom_y, denom_d):
    i = pl.program_id(0)

    @pl.when(i == 0)
    def _init():
        acc_ref[0] = 0.0
        acc_ref[1] = 0.0
        acc_ref[2] = 0.0

    re = re_ref[...].astype(jnp.float32)
    im = im_ref[...].astype(jnp.float32)

    if use_xy:
        dx_r = re[:, :, 1:] - re[:, :, :-1]
        dx_i = im[:, :, 1:] - im[:, :, :-1]
        dy_r = re[:, 1:, :] - re[:, :-1, :]
        dy_i = im[:, 1:, :] - im[:, :-1, :]
        acc_ref[0] = acc_ref[0] + jnp.sum(dx_r * dx_r) + jnp.sum(dx_i * dx_i)
        acc_ref[1] = acc_ref[1] + jnp.sum(dy_r * dy_r) + jnp.sum(dy_i * dy_i)

    if use_diag:
        dd_r = re[:, 1:, 1:] - re[:, :-1, :-1]
        dd_i = im[:, 1:, 1:] - im[:, :-1, :-1]
        acc_ref[2] = acc_ref[2] + jnp.sum(dd_r * dd_r) + jnp.sum(dd_i * dd_i)

    @pl.when(i == pl.num_programs(0) - 1)
    def _finalize():
        loss = jnp.float32(0.0)
        if use_xy:
            loss = loss + acc_ref[0] / denom_x + acc_ref[1] / denom_y
        if use_diag:
            loss = loss + acc_ref[2] / denom_d
        o_ref[0, 0] = loss


def _pick_batch_tile(bs, slab_bytes):
    """Largest divisor of bs whose block stays under the VMEM target."""
    cap = max(1, _TARGET_BLOCK_BYTES // max(slab_bytes, 1))
    tile_b = 1
    for d in range(1, bs + 1):
        if bs % d == 0 and d <= cap:
            tile_b = d
    return tile_b


@functools.partial(jax.jit, static_argnames=("mode",))
def transfer_matrix_smooth_error(transfer_matrix, mode="xy"):
    """Pallas implementation of TransferMatrixSmoothError.forward."""
    if mode not in ("xy", "diag", "both"):
        raise ValueError(f"Invalid mode: {mode}")
    use_xy = mode in ("xy", "both")
    use_diag = mode in ("diag", "both")

    x = jnp.asarray(transfer_matrix)
    # Split complex into real/imag f32 planes once (Pallas refs are real).
    # TODO(synk): a complex64 -> interleaved-f32 bitcast would avoid these two
    # extra HBM passes, but the real/imag split is kept for portability.
    if jnp.iscomplexobj(x):
        re = jnp.real(x).astype(jnp.float32)
        im = jnp.imag(x).astype(jnp.float32)
    else:
        re = x.astype(jnp.float32)
        im = jnp.zeros_like(re)

    # Collapse any leading dims into a single batch axis (free reshape).
    H, W = re.shape[-2], re.shape[-1]
    re = re.reshape(-1, H, W)
    im = im.reshape(-1, H, W)
    bs = re.shape[0]

    # Grid tiles only the batch axis; H/W stay at full extent (no padding).
    tile_b = _pick_batch_tile(bs, H * W * 4)
    n_blocks = bs // tile_b

    denom_x = float(bs * H * (W - 1))
    denom_y = float(bs * (H - 1) * W)
    denom_d = float(bs * (H - 1) * (W - 1))

    kernel = functools.partial(
        _smooth_kernel,
        use_xy=use_xy, use_diag=use_diag,
        denom_x=denom_x, denom_y=denom_y, denom_d=denom_d,
    )

    out = pl.pallas_call(
        kernel,
        out_shape=jax.ShapeDtypeStruct((1, 1), jnp.float32),
        grid_spec=pltpu.PrefetchScalarGridSpec(
            num_scalar_prefetch=0,
            grid=(n_blocks,),
            in_specs=[
                pl.BlockSpec((tile_b, H, W), lambda i: (i, 0, 0)),
                pl.BlockSpec((tile_b, H, W), lambda i: (i, 0, 0)),
            ],
            out_specs=pl.BlockSpec(memory_space=pltpu.SMEM),
            scratch_shapes=[pltpu.SMEM((3,), jnp.float32)],
        ),
        compiler_params=pltpu.CompilerParams(
            dimension_semantics=("arbitrary",),
        ),
    )(re, im)
    return out[0, 0]


def _reference(tm, mode):
    dx = tm[..., :, 1:] - tm[..., :, :-1]
    dy = tm[..., 1:, :] - tm[..., :-1, :]
    dd = tm[..., 1:, 1:] - tm[..., :-1, :-1]
    amp = lambda z: jnp.real(z) ** 2 + jnp.imag(z) ** 2
    lx = amp(dx).mean()
    ly = amp(dy).mean()
    ld = amp(dd).mean()
    if mode == "xy":
        return lx + ly
    if mode == "diag":
        return ld
    return lx + ly + ld


if __name__ == "__main__":
    key = jax.random.PRNGKey(0)
    k_re, k_im = jax.random.split(key)
    bs, H, W = 2, 16, 16
    # Complex transfer matrix of shape (bs, H, W), as the PyTorch module expects.
    re = jax.random.normal(k_re, (bs, H, W), dtype=jnp.float32)
    im = jax.random.normal(k_im, (bs, H, W), dtype=jnp.float32)
    tm = re + 1j * im  # complex64

    for mode in ("xy", "diag", "both"):
        result = transfer_matrix_smooth_error(tm, mode=mode)
        jax.block_until_ready(result)
        expected = _reference(tm, mode)
        assert jnp.allclose(result, expected, atol=1e-5, rtol=1e-5), (
            mode, result, expected)

    print("KERNEL_OK")
</pallas_src>

<mosaic_0001>
module attributes {stable_mosaic.version = 11 : i64} {
  func.func @_smooth_kernel(%arg0: i32, %arg1: memref<2x16x16xf32, #tpu.memory_space<vmem>>, %arg2: memref<2x16x16xf32, #tpu.memory_space<vmem>>, %arg3: memref<1x1xf32, #tpu.memory_space<smem>>, %arg4: memref<3xf32, #tpu.memory_space<smem>>) attributes {dimension_semantics = [#tpu.dimension_semantics<arbitrary>], iteration_bounds = array<i64: 1>, scalar_prefetch = 0 : i64, scratch_operands = 1 : i64, tpu.core_type = #tpu.core_type<tc>, window_params = [{transform_indices = @transform_0, window_bounds = array<i64: 2, 16, 16>}, {transform_indices = @transform_1, window_bounds = array<i64: 2, 16, 16>}, {transform_indices = @transform_2, window_bounds = array<i64: 1, 1>}]} {
    %c0_i32 = arith.constant 0 : i32
    %0 = arith.cmpi eq, %arg0, %c0_i32 : i32
    %1 = arith.extui %0 : i1 to i32
    %c0_i32_0 = arith.constant 0 : i32
    %2 = arith.cmpi ne, %1, %c0_i32_0 : i32
    scf.if %2 {
      %cst_14 = arith.constant 0.000000e+00 : f32
      %c0_15 = arith.constant 0 : index
      %48 = memref.load %arg4[%c0_15] : memref<3xf32, #tpu.memory_space<smem>>
      memref.store %cst_14, %arg4[%c0_15] : memref<3xf32, #tpu.memory_space<smem>>
      %cst_16 = arith.constant 0.000000e+00 : f32
      %c1_17 = arith.constant 1 : index
      %49 = memref.load %arg4[%c1_17] : memref<3xf32, #tpu.memory_space<smem>>
      memref.store %cst_16, %arg4[%c1_17] : memref<3xf32, #tpu.memory_space<smem>>
      %cst_18 = arith.constant 0.000000e+00 : f32
      %c2 = arith.constant 2 : index
      %50 = memref.load %arg4[%c2] : memref<3xf32, #tpu.memory_space<smem>>
      memref.store %cst_18, %arg4[%c2] : memref<3xf32, #tpu.memory_space<smem>>
    } else {
    }
    %c0 = arith.constant 0 : index
    %c0_1 = arith.constant 0 : index
    %c0_2 = arith.constant 0 : index
    %3 = vector.load %arg1[%c0, %c0_1, %c0_2] : memref<2x16x16xf32, #tpu.memory_space<vmem>>, vector<2x16x16xf32>
    %c0_3 = arith.constant 0 : index
    %c0_4 = arith.constant 0 : index
    %c0_5 = arith.constant 0 : index
    %4 = vector.load %arg2[%c0_3, %c0_4, %c0_5] : memref<2x16x16xf32, #tpu.memory_space<vmem>>, vector<2x16x16xf32>
    %5 = vector.extract_strided_slice %3 {offsets = [0, 0, 1], sizes = [2, 16, 15], strides = [1, 1, 1]} : vector<2x16x16xf32> to vector<2x16x15xf32>
    %6 = vector.extract_strided_slice %3 {offsets = [0, 0, 0], sizes = [2, 16, 15], strides = [1, 1, 1]} : vector<2x16x16xf32> to vector<2x16x15xf32>
    %7 = arith.subf %5, %6 : vector<2x16x15xf32>
    %8 = vector.extract_strided_slice %4 {offsets = [0, 0, 1], sizes = [2, 16, 15], strides = [1, 1, 1]} : vector<2x16x16xf32> to vector<2x16x15xf32>
    %9 = vector.extract_strided_slice %4 {offsets = [0, 0, 0], sizes = [2, 16, 15], strides = [1, 1, 1]} : vector<2x16x16xf32> to vector<2x16x15xf32>
    %10 = arith.subf %8, %9 : vector<2x16x15xf32>
    %11 = vector.extract_strided_slice %3 {offsets = [0, 1, 0], sizes = [2, 15, 16], strides = [1, 1, 1]} : vector<2x16x16xf32> to vector<2x15x16xf32>
    %12 = vector.extract_strided_slice %3 {offsets = [0, 0, 0], sizes = [2, 15, 16], strides = [1, 1, 1]} : vector<2x16x16xf32> to vector<2x15x16xf32>
    %13 = arith.subf %11, %12 : vector<2x15x16xf32>
    %14 = vector.extract_strided_slice %4 {offsets = [0, 1, 0], sizes = [2, 15, 16], strides = [1, 1, 1]} : vector<2x16x16xf32> to vector<2x15x16xf32>
    %15 = vector.extract_strided_slice %4 {offsets = [0, 0, 0], sizes = [2, 15, 16], strides = [1, 1, 1]} : vector<2x16x16xf32> to vector<2x15x16xf32>
    %16 = arith.subf %14, %15 : vector<2x15x16xf32>
    %c0_6 = arith.constant 0 : index
    %17 = memref.load %arg4[%c0_6] : memref<3xf32, #tpu.memory_space<smem>>
    %18 = arith.mulf %7, %7 : vector<2x16x15xf32>
    %19 = vector.shape_cast %18 : vector<2x16x15xf32> to vector<1x2x16x15xf32>
    %cst = arith.constant dense<0.000000e+00> : vector<1xf32>
    %20 = vector.multi_reduction <add>, %19, %cst [1, 2, 3] : vector<1x2x16x15xf32> to vector<1xf32>
    %21 = vector.shape_cast %20 : vector<1xf32> to vector<1x1x1x1xf32>
    %22 = vector.extract %21[0, 0, 0, 0] : f32 from vector<1x1x1x1xf32>
    %23 = arith.addf %17, %22 : f32
    %24 = arith.mulf %10, %10 : vector<2x16x15xf32>
    %25 = vector.shape_cast %24 : vector<2x16x15xf32> to vector<1x2x16x15xf32>
    %cst_7 = arith.constant dense<0.000000e+00> : vector<1xf32>
    %26 = vector.multi_reduction <add>, %25, %cst_7 [1, 2, 3] : vector<1x2x16x15xf32> to vector<1xf32>
    %27 = vector.shape_cast %26 : vector<1xf32> to vector<1x1x1x1xf32>
    %28 = vector.extract %27[0, 0, 0, 0] : f32 from vector<1x1x1x1xf32>
    %29 = arith.addf %23, %28 : f32
    %c0_8 = arith.constant 0 : index
    %30 = memref.load %arg4[%c0_8] : memref<3xf32, #tpu.memory_space<smem>>
    memref.store %29, %arg4[%c0_8] : memref<3xf32, #tpu.memory_space<smem>>
    %c1 = arith.constant 1 : index
    %31 = memref.load %arg4[%c1] : memref<3xf32, #tpu.memory_space<smem>>
    %32 = arith.mulf %13, %13 : vector<2x15x16xf32>
    %33 = vector.shape_cast %32 : vector<2x15x16xf32> to vector<1x2x15x16xf32>
    %cst_9 = arith.constant dense<0.000000e+00> : vector<1xf32>
    %34 = vector.multi_reduction <add>, %33, %cst_9 [1, 2, 3] : vector<1x2x15x16xf32> to vector<1xf32>
    %35 = vector.shape_cast %34 : vector<1xf32> to vector<1x1x1x1xf32>
    %36 = vector.extract %35[0, 0, 0, 0] : f32 from vector<1x1x1x1xf32>
    %37 = arith.addf %31, %36 : f32
    %38 = arith.mulf %16, %16 : vector<2x15x16xf32>
    %39 = vector.shape_cast %38 : vector<2x15x16xf32> to vector<1x2x15x16xf32>
    %cst_10 = arith.constant dense<0.000000e+00> : vector<1xf32>
    %40 = vector.multi_reduction <add>, %39, %cst_10 [1, 2, 3] : vector<1x2x15x16xf32> to vector<1xf32>
    %41 = vector.shape_cast %40 : vector<1xf32> to vector<1x1x1x1xf32>
    %42 = vector.extract %41[0, 0, 0, 0] : f32 from vector<1x1x1x1xf32>
    %43 = arith.addf %37, %42 : f32
    %c1_11 = arith.constant 1 : index
    %44 = memref.load %arg4[%c1_11] : memref<3xf32, #tpu.memory_space<smem>>
    memref.store %43, %arg4[%c1_11] : memref<3xf32, #tpu.memory_space<smem>>
    %c0_i32_12 = arith.constant 0 : i32
    %45 = arith.cmpi eq, %arg0, %c0_i32_12 : i32
    %46 = arith.extui %45 : i1 to i32
    %c0_i32_13 = arith.constant 0 : i32
    %47 = arith.cmpi ne, %46, %c0_i32_13 : i32
    scf.if %47 {
      %c0_14 = arith.constant 0 : index
      %48 = memref.load %arg4[%c0_14] : memref<3xf32, #tpu.memory_space<smem>>
      %cst_15 = arith.constant 4.800000e+02 : f32
      %49 = arith.divf %48, %cst_15 : f32
      %cst_16 = arith.constant 0.000000e+00 : f32
      %50 = arith.addf %cst_16, %49 : f32
      %c1_17 = arith.constant 1 : index
      %51 = memref.load %arg4[%c1_17] : memref<3xf32, #tpu.memory_space<smem>>
      %cst_18 = arith.constant 4.800000e+02 : f32
      %52 = arith.divf %51, %cst_18 : f32
      %53 = arith.addf %50, %52 : f32
      %c0_19 = arith.constant 0 : index
      %c0_20 = arith.constant 0 : index
      %54 = memref.load %arg3[%c0_19, %c0_20] : memref<1x1xf32, #tpu.memory_space<smem>>
      memref.store %53, %arg3[%c0_19, %c0_20] : memref<1x1xf32, #tpu.memory_space<smem>>
    } else {
    }
    return
  }
  func.func @transform_0(%arg0: i32) -> (i32, i32, i32) {
    %c0_i32 = arith.constant 0 : i32
    %c0_i32_0 = arith.constant 0 : i32
    %c0_i32_1 = arith.constant 0 : i32
    return %arg0, %c0_i32, %c0_i32_0 : i32, i32, i32
  }
  func.func @transform_1(%arg0: i32) -> (i32, i32, i32) {
    %c0_i32 = arith.constant 0 : i32
    %c0_i32_0 = arith.constant 0 : i32
    %c0_i32_1 = arith.constant 0 : i32
    return %arg0, %c0_i32, %c0_i32_0 : i32, i32, i32
  }
  func.func @transform_2(%arg0: i32) -> (i32, i32) {
    %c0_i32 = arith.constant 0 : i32
    %c0_i32_0 = arith.constant 0 : i32
    %c0_i32_1 = arith.constant 0 : i32
    return %c0_i32, %c0_i32_0 : i32, i32
  }
}

</mosaic_0001>

<bundles_post_ra>
// kernel: custom-call.1
= control target key start
LH: loop header
LB: loop body
LE: loop exit
PB: predicated region body
PF: predicated region fallthrough
CT: control target
= control target key end

     0   :  { %s56_s0 = inlined_call_operand.hbm [shape: c64[2,16,16], index: 0, kind: input, shape index: {}]   ;;  %s57_s1 = inlined_call_operand.vmem [shape: f32[2,16,16], index: 1, kind: output, shape index: {}]  }
   0x1   :  { %s2_s8 = scalar_lea.hbm %s56_s0, 32 }
   0x2   :  { %3 = vsyncpa [#allocation0], 0  ;;  %s5_s9 = sshll.u32 %s2_s8, 4  ;;  %s7_s12 = sshll.u32 %s57_s1, 4  ;;  %s6_s9 = int_to_ptr.hbm [resolvable:$true] %s5_s9  ;;  %s8_s12 = int_to_ptr.vmem [resolvable:$true] %s7_s12 }
   0x3   :  { %10 = dma.hbm_to_vmem [thread:$0]  %s6_s9, 512, %s8_s12, [#allocation0] }
   0x4   :  { %38 = dma.done.wait [#allocation0], 512  }
   0x5   :  { %39 = vsyncadd [#allocation0], 4294966784 }
   0x6   :  { %13 = vsyncpa [#allocation0], 1 }

// kernel: custom-call
= control target key start
LH: loop header
LB: loop body
LE: loop exit
PB: predicated region body
PF: predicated region fallthrough
CT: control target
= control target key end

     0   :  { %2 = vsyncpa [#allocation0], 0  ;;  %s55_s0 = inlined_call_operand.hbm [shape: c64[2,16,16], index: 0, kind: input, shape index: {}]   ;;  %s56_s1 = inlined_call_operand.vmem [shape: f32[2,16,16], index: 1, kind: output, shape index: {}]  }
   0x1   :  { %s4_s8 = sshll.u32 %s55_s0, 4  ;;  %s6_s11 = sshll.u32 %s56_s1, 4  ;;  %s5_s8 = int_to_ptr.hbm [resolvable:$true] %s4_s8  ;;  %s7_s11 = int_to_ptr.vmem [resolvable:$true] %s6_s11 }
   0x2   :  { %9 = dma.hbm_to_vmem [thread:$0]  %s5_s8, 512, %s7_s11, [#allocation0] }
   0x3   :  { %37 = dma.done.wait [#allocation0], 512  }
   0x4   :  { %38 = vsyncadd [#allocation0], 4294966784 }
   0x5   :  { %12 = vsyncpa [#allocation0], 1 }

// kernel: transfer_matrix_smooth_error.1
= control target key start
LH: loop header
LB: loop body
LE: loop exit
PB: predicated region body
PF: predicated region fallthrough
CT: control target
= control target key end

     0   :  { %s327_s13 = smov 1   ;;  %s421_s0 = inlined_call_operand.vmem [shape: f32[2,16,16], index: 0, kind: input, shape index: {}]   ;;  %s422_s1 = inlined_call_operand.vmem [shape: f32[2,16,16], index: 1, kind: input, shape index: {}]   ;;  %s423_s2 = inlined_call_operand.hbm [shape: f32[1,1], index: 2, kind: output, shape index: {}]  }
   0x1   :  { %v349_v0 = vld [vmem:[%s422_s1] sm:$0xff]  ;;  %v24_v2 = vld [vmem:[%s421_s0 + $0x10] sm:$0xff] }
   0x2   :  { %v22_v1 = vld [vmem:[%s421_s0] sm:$0xff]  ;;  %54 = vrot.lane.b32.xlu1 %v349_v0, %s327_s13  ;;  %38 = vrot.lane.b32.xlu2 %v24_v2, %s327_s13 }
   0x3   :  { %34 = vrot.lane.b32.xlu0 %v22_v1, %s327_s13 }
   0x4   :  { %7 = vsyncpa [#allocation4], 0  ;;  %v23_v3 = vld [vmem:[%s421_s0 + $0x8] sm:$0xff]  ;;  %v369_v5 = vld [vmem:[%s422_s1 + $0x10] sm:$0xff]  ;;  %s328_s26 = smov 127   ;;  %v71_v32 = vrot.slane %v22_v1, 7 }
   0x5   :  { %v364_v4 = vld [vmem:[%s422_s1 + $0x8] sm:$0xff]  ;;  %v376_v6 = vld [vmem:[%s422_s1 + $0x18] sm:$0xff]  ;;  %v72_v33 = vrot.slane %v23_v3, 7  ;;  %vm70_vm0 = vcmask 1040384   ;;  %v74_v34 = vrot.slane %v24_v2, 7  ;;  %vm186_vm1 = vcmask 1046528  }
   0x6   :  { %v25_v7 = vld [vmem:[%s421_s0 + $0x18] sm:$0xff]  ;;  %v81_v36 = vsub.f32 %v22_v1, %v71_v32  ;;  %vm197_vm2 = vcmask 130048   ;;  %vm199_vm3 = vcmask 129024   ;;  %v85_v60 = vrot.slane %v349_v0, 7  ;;  %s285_s7 = sshll.u32 %s423_s2, 4  ;;  %s330_s10 = smov [#allocation3]   ;;  %s286_s7 = int_to_ptr.hbm [resolvable:$true] %s285_s7 }
   0x7   :  { %v73_v35 = vsel %vm70_vm0, %v71_v32, %v72_v33  ;;  %v83_v38 = vsub.f32 %v24_v2, %v74_v34  ;;  %v75_v39 = vrot.slane %v25_v7, 7  ;;  %v86_v61 = vrot.slane %v364_v4, 7 }
   0x8   :  { %v82_v37 = vsub.f32 %v23_v3, %v73_v35  ;;  %v178_v40 = vmul.f32 %v81_v36, %v81_v36  ;;  %v89_v63 = vrot.slane %v376_v6, 7  ;;  %vm120_vm4 = vcmask 121856  }
   0x9   :  { %v180_v42 = vmul.f32 %v83_v38, %v83_v38  ;;  %v76_v43 = vsel %vm70_vm0, %v74_v34, %v75_v39  ;;  %v87_v62 = vsel %vm70_vm0, %v85_v60, %v86_v61 }
   0xa   :  { %56 = vrot.lane.b32.xlu1 %v364_v4, %s327_s13  ;;  %58 = vrot.lane.b32.xlu2 %v369_v5, %s327_s13  ;;  %v179_v41 = vmul.f32 %v82_v37, %v82_v37  ;;  %v187_v44 = vrot.slane %v178_v40, 1  ;;  %v84_v45 = vsub.f32 %v25_v7, %v76_v43 }
   0xb   :  { %36 = vrot.lane.b32.xlu0 %v23_v3, %s327_s13  ;;  %v190_v46 = vrot.slane %v180_v42, 1 }
   0xc   :  { %v181_v47 = vmul.f32 %v84_v45, %v84_v45  ;;  %v188_v48 = vrot.slane %v179_v41, 1 }
   0xe   :  { %v189_v49 = vsel %vm186_vm1, %v187_v44, %v188_v48  ;;  %v191_v50 = vrot.slane %v181_v47, 1  ;;  %v200_v52 = vsel %vm199_vm3, %v188_v48, 0.0  ;;  %v329_v48 = vmov 480.0  }
   0xf   :  { %v198_v51 = vsel %vm197_vm2, %v189_v49, 0.0  ;;  %311 = vrcp.f32 %v329_v48 }
  0x10   :  { %v192_v53 = vsel %vm186_vm1, %v190_v46, %v191_v50  ;;  %v201_v54 = vadd.f32 %v200_v52, %v198_v51  ;;  %v204_v57 = vsel %vm199_vm3, %v191_v50, 0.0 }
  0x11   :  { %v202_v55 = vsel %vm197_vm2, %v192_v53, 0.0 }
  0x12   :  { %60 = vrot.lane.b32.xlu1 %v376_v6, %s327_s13  ;;  %v203_v56 = vadd.f32 %v202_v55, %v201_v54 }
  0x13   :  { %40 = vrot.lane.b32.xlu0 %v25_v7, %s327_s13 }
  0x14   :  { %v205_v58 = vadd.f32 %v204_v57, %v203_v56 }
  0x15   :  { %v312_v53 = vpop.eup %311 }
  0x16   :  { %vm262_vm5 = vweird.f32 %v312_v53 }
  0x5c   :  { %v39_v8 = vpop.permute.xlu2 %38 }
  0x5d   :  { %v48_v24 = vsub.f32 %v24_v2, %v39_v8  ;;  %v95_v2 = vsub.f32 %v349_v0, %v85_v60  ;;  %v258_v60 = vmul.f32 480.0, %v312_v53 }
  0x5f   :  { %v102_v28 = vmul.f32 %v48_v24, %v48_v24 }
  0x64   :  { %v59_v13 = vpop.permute.xlu2 %58 }
  0x65   :  { %v68_v16 = vsub.f32 %v369_v5, %v59_v13 }
  0x67   :  { %v140_v19 = vmul.f32 %v68_v16, %v68_v16 }
  0x74   :  { %v55_v9 = vpop.permute.xlu1 %54 }
  0x75   :  { %v35_v10 = vpop.permute.xlu0 %34  ;;  %v66_v11 = vsub.f32 %v349_v0, %v55_v9 }
  0x76   :  { %v46_v12 = vsub.f32 %v22_v1, %v35_v10  ;;  %v88_v1 = vrot.slane %v369_v5, 7 }
  0x77   :  { %v138_v14 = vmul.f32 %v66_v11, %v66_v11  ;;  %v216_v11 = vmul.f32 %v95_v2, %v95_v2  ;;  %v259_v2 = vsub.f32 1.0, %v258_v60 }
  0x78   :  { %v100_v15 = vmul.f32 %v46_v12, %v46_v12  ;;  %v90_v8 = vsel %vm70_vm0, %v88_v1, %v89_v63  ;;  %v97_v13 = vsub.f32 %v369_v5, %v88_v1 }
  0x79   :  { %146 = vrot.lane.b32.xlu1 %v138_v14, %s328_s26  ;;  %v98_v14 = vsub.f32 %v376_v6, %v90_v8  ;;  %v224_v16 = vrot.slane %v216_v11, 1 }
  0x7a   :  { %108 = vrot.lane.b32.xlu2 %v100_v15, %s328_s26 }
  0x7b   :  { %v219_v0 = vmul.f32 %v98_v14, %v98_v14 }
  0x7c   :  { %v57_v18 = vpop.permute.xlu1 %56 }
  0x7d   :  { %v37_v17 = vpop.permute.xlu0 %36  ;;  %v67_v21 = vsub.f32 %v364_v4, %v57_v18 }
  0x7e   :  { %v47_v20 = vsub.f32 %v23_v3, %v37_v17  ;;  %v96_v3 = vsub.f32 %v364_v4, %v87_v62  ;;  %v218_v17 = vmul.f32 %v97_v13, %v97_v13 }
  0x7f   :  { %v139_v23 = vmul.f32 %v67_v21, %v67_v21 }
  0x80   :  { %v101_v22 = vmul.f32 %v47_v20, %v47_v20  ;;  %v217_v12 = vmul.f32 %v96_v3, %v96_v3  ;;  %v227_v24 = vrot.slane %v218_v17, 1 }
  0x81   :  { %150 = vrot.lane.b32.xlu1 %v140_v19, %s328_s26 }
  0x82   :  { %110 = vrot.lane.b32.xlu0 %v101_v22, %s328_s26  ;;  %148 = vrot.lane.b32.xlu2 %v139_v23, %s328_s26  ;;  %v225_v19 = vrot.slane %v217_v12, 1  ;;  %v260_v12 = vmul.f32 %v312_v53, %v259_v2 }
  0x84   :  { %v61_v27 = vpop.permute.xlu1 %60  ;;  %v235_v32 = vsel %vm199_vm3, %v225_v19, 0.0 }
  0x85   :  { %v41_v25 = vpop.permute.xlu0 %40  ;;  %v69_v30 = vsub.f32 %v376_v6, %v61_v27  ;;  %v226_v6 = vsel %vm186_vm1, %v224_v16, %v225_v19 }
  0x86   :  { %v49_v26 = vsub.f32 %v25_v7, %v41_v25 }
  0x87   :  { %v141_v31 = vmul.f32 %v69_v30, %v69_v30 }
  0x88   :  { %v103_v29 = vmul.f32 %v49_v26, %v49_v26  ;;  %v228_v26 = vrot.slane %v219_v0, 1 }
  0x8a   :  { %112 = vrot.lane.b32.xlu0 %v102_v28, %s328_s26  ;;  %114 = vrot.lane.b32.xlu2 %v103_v29, %s328_s26  ;;  %v229_v34 = vsel %vm186_vm1, %v227_v24, %v228_v26  ;;  %v239_v42 = vsel %vm199_vm3, %v228_v26, 0.0 }
  0x8b   :  { %v237_v39 = vsel %vm197_vm2, %v229_v34, 0.0 }
  0x92   :  { %152 = vrot.lane.b32.xlu0 %v141_v31, %s328_s26  ;;  %v234_v31 = vsel %vm197_vm2, %v226_v6, 0.0 }
  0x93   :  { %v236_v37 = vadd.f32 %v235_v32, %v234_v31 }
  0x95   :  { %v238_v41 = vadd.f32 %v237_v39, %v236_v37 }
  0x97   :  { %v240_v43 = vadd.f32 %v239_v42, %v238_v41 }
  0xbc   :  { %206 = vadd.xlane.f32.xlu0 %v205_v58 }
  0xd4   :  { %v109_v59 = vpop.permute.xlu2 %108 }
  0xd5   :  { %v121_v4 = vsel %vm120_vm4, %v109_v59, 0.0 }
  0xdc   :  { %v149_v7 = vpop.permute.xlu2 %148 }
  0xdd   :  { %v159_v29 = vsel %vm120_vm4, %v149_v7, 0.0 }
  0xe4   :  { %v115_v18 = vpop.permute.xlu2 %114 }
  0xe5   :  { %v126_v23 = vsel %vm120_vm4, %v115_v18, 0.0 }
  0xeb   :  { %v147_v9 = vpop.permute.xlu1 %146 }
  0xec   :  { %v158_v27 = vsel %vm120_vm4, %v147_v9, 0.0 }
  0xed   :  { %v160_v33 = vadd.f32 %v159_v29, %v158_v27 }
  0xf3   :  { %v151_v5 = vpop.permute.xlu1 %150 }
  0xf4   :  { %v111_v10 = vpop.permute.xlu0 %110  ;;  %v161_v30 = vsel %vm120_vm4, %v151_v5, 0.0 }
  0xf5   :  { %v122_v15 = vsel %vm120_vm4, %v111_v10, 0.0  ;;  %v162_v35 = vadd.f32 %v161_v30, %v160_v33 }
  0xf6   :  { %v123_v20 = vadd.f32 %v122_v15, %v121_v4  ;;  %v261_v15 = vadd.f32 %v312_v53, %v260_v12 }
  0xf8   :  { %v263_v18 = vsel %vm262_vm5, %v312_v53, %v261_v15 }
  0xfc   :  { %v113_v21 = vpop.permute.xlu0 %112 }
  0xfd   :  { %v124_v22 = vsel %vm120_vm4, %v113_v21, 0.0 }
  0xfe   :  { %v125_v25 = vadd.f32 %v124_v22, %v123_v20 }
 0x100   :  { %v127_v28 = vadd.f32 %v126_v23, %v125_v25 }
 0x102   :  { %128 = vadd.xlane.f32.xlu1 %v127_v28 }
 0x104   :  { %v153_v36 = vpop.permute.xlu0 %152 }
 0x105   :  { %v163_v38 = vsel %vm120_vm4, %v153_v36, 0.0 }
 0x106   :  { %v164_v40 = vadd.f32 %v163_v38, %v162_v35 }
 0x108   :  { %165 = vadd.xlane.f32.xlu2 %v164_v40 }
 0x110   :  { %241 = vadd.xlane.f32.xlu2 %v240_v43 }
 0x12f   :  { %v207_v44 = vpop.xlane.xlu0 %206 }
 0x130   :  { %v208_v45 = vrot.slane %v207_v44, 4 }
 0x132   :  { %v209_v47 = vadd.f32 %v208_v45, %v207_v44 }
 0x134   :  { %v210_v51 = vrot.slane %v209_v47, 2 }
 0x136   :  { %v211_v57 = vadd.f32 %v210_v51, %v209_v47 }
 0x138   :  { %v212_v63 = vrot.slane %v211_v57, 1 }
 0x13a   :  { %v213_v9 = vadd.f32 %v212_v63, %v211_v57 }
 0x175   :  { %v129_v46 = vpop.xlane.xlu1 %128 }
 0x176   :  { %v130_v49 = vrot.slane %v129_v46, 4 }
 0x178   :  { %v131_v50 = vadd.f32 %v130_v49, %v129_v46 }
 0x17a   :  { %v132_v52 = vrot.slane %v131_v50, 2 }
 0x17b   :  { %v166_v54 = vpop.xlane.xlu2 %165 }
 0x17c   :  { %v167_v55 = vrot.slane %v166_v54, 4  ;;  %v133_v56 = vadd.f32 %v132_v52, %v131_v50 }
 0x17e   :  { %v168_v58 = vadd.f32 %v167_v55, %v166_v54  ;;  %v134_v59 = vrot.slane %v133_v56, 1 }
 0x180   :  { %v169_v61 = vrot.slane %v168_v58, 2  ;;  %v135_v62 = vadd.f32 %v134_v59, %v133_v56 }
 0x182   :  { %297 = vpush %v135_v62  ;;  %v170_v1 = vadd.f32 %v169_v61, %v168_v58 }
 0x183   :  { %v242_v3 = vpop.xlane.xlu2 %241 }
 0x184   :  { %v243_v7 = vrot.slane %v242_v3, 4  ;;  %v171_v8 = vrot.slane %v170_v1, 1 }
 0x186   :  { %v244_v10 = vadd.f32 %v243_v7, %v242_v3  ;;  %v172_v11 = vadd.f32 %v171_v8, %v170_v1 }
 0x188   :  { %v245_v13 = vrot.slane %v244_v10, 2  ;;  %299 = vpush %v172_v11 }
 0x189   :  { %301 = vpush %v213_v9 }
 0x18a   :  { %v246_v14 = vadd.f32 %v245_v13, %v244_v10 }
 0x18c   :  { %v247_v16 = vrot.slane %v246_v14, 1 }
 0x18e   :  { %v248_v17 = vadd.f32 %v247_v16, %v246_v14 }
 0x190   :  { %303 = vpush %v248_v17 }
 0x191   :  { %305 = vpush %v263_v18 }
 0x1b3   :  { %s298_s0 = spop %297 }
 0x1b9   :  { %s300_s1 = spop %299 }
 0x1ba   :  { %s302_s27 = spop %301  ;;  %s174_s28 = sadd.f32 %s300_s1, %s298_s0 }
 0x1c1   :  { %s304_s29 = spop %303 }
 0x1c2   :  { %s250_s30 = sadd.f32 %s304_s29, %s302_s27  ;;  %s306_s3 = spop %305 }
 0x1c3   :  { %s265_s4 = smul.f32 %s306_s3, %s174_s28 }
 0x1c4   :  { %s276_s8 = smul.f32 %s306_s3, %s250_s30 }
 0x1c6   :  { %s277_s9 = sadd.f32 %s276_s8, %s265_s4 }
 0x1c8   :  { %279 = sst [smem:[#allocation3]] %s277_s9 }
 0x1c9   :  { %288 = dma.smem_to_hbm %s330_s10, 16, %s286_s7, [#allocation4]  }
 0x1ca   :  { %325 = dma.done.wait [#allocation4], 16  }
 0x1cb   :  { %326 = vsyncadd [#allocation4], 4294967280 }
 0x1cc   :  { %293 = sfence }
 0x1cd   :  { %294 = vsyncpa [#allocation4], 1 }

</bundles_post_ra>
